<compile_context>
chip_gen: v7x
topology: tpu7x:2x2x1
jax: 0.10.0
libtpu: 0.0.40
codegen_flags: <defaults>
</compile_context>

<pallas_src>
import jax
import jax.numpy as jnp
from jax import lax
from jax.experimental import pallas as pl
from jax.experimental.pallas import tpu as pltpu


def _round_up(x, m):
    return (x + m - 1) // m * m


def _conv_matmul_kernel(w_ref, p_ref, b_ref, o_ref):
    # w_ref: (Cp, K)   bf16 flattened conv weights; Cout padded 10 -> 16 sublanes
    # p_ref: (K, TM)   bf16 im2col patch columns; M rides lanes (TM % 128 == 0)
    # b_ref: (Cp, 1)   f32 bias with the "- 42.0" constant already folded in
    # o_ref: (Cp, TM)  f32 lane-dense output block -> unmasked vector stores
    o_ref[...] = (
        jnp.dot(w_ref[...], p_ref[...], preferred_element_type=jnp.float32)
        + b_ref[...]
    )


def conv3d_sub42(x, weight, bias, *, stride=(2, 2, 2), padding=(2, 2, 2)):
    """x: (N, Cin, D, H, W); weight: (Cout, Cin, Kd, Kh, Kw); bias: (Cout,)."""
    N, Cin, D, H, W = x.shape
    Cout, _, Kd, Kh, Kw = weight.shape
    sd, sh, sw = stride
    pd, ph, pw = padding

    # ---- glue: fused im2col (identity-kernel conv), exact in f32 ----
    # patches: (N, K, Do, Ho, Wo) with K = Cin*Kd*Kh*Kw, feature order
    # (cin, kd, kh, kw) row-major == weight.reshape(Cout, K) column order.
    patches = lax.conv_general_dilated_patches(
        x.astype(jnp.float32),
        filter_shape=(Kd, Kh, Kw),
        window_strides=(sd, sh, sw),
        padding=((pd, pd), (ph, ph), (pw, pw)),
    )
    K = Cin * Kd * Kh * Kw
    Do, Ho, Wo = patches.shape[2], patches.shape[3], patches.shape[4]
    M = N * Do * Ho * Wo

    # (K, M): M ordered (n, do, ho, wo) row-major; M rides the lane dim.
    patchesT = jnp.transpose(patches, (1, 0, 2, 3, 4)).reshape(K, M)
    patchesT = patchesT.astype(jnp.bfloat16)

    # ---- tile sizing: lane-dense M tiles, sublane-padded Cout ----
    TM = min(1024, _round_up(M, 128))        # lane-dense; grid >= 2 at prod M
    Mp = _round_up(M, TM)
    Cp = _round_up(Cout, 8)                  # 10 -> 16 sublanes (not 128 lanes)

    patchesT = jnp.pad(patchesT, ((0, 0), (0, Mp - M)))

    w2d = weight.reshape(Cout, K).astype(jnp.bfloat16)          # (Cout, K)
    w2d = jnp.pad(w2d, ((0, Cp - Cout), (0, 0)))                # (Cp, K)

    # fold the elementwise "- 42.0" into the bias (f32, exact either way)
    b2d = (bias.astype(jnp.float32) - jnp.float32(42.0)).reshape(Cout, 1)
    b2d = jnp.pad(b2d, ((0, Cp - Cout), (0, 0)))                # (Cp, 1)

    # ---- hot path: tiled Pallas kernel (matmul + fused bias/subtract) ----
    out2d = pl.pallas_call(
        _conv_matmul_kernel,
        out_shape=jax.ShapeDtypeStruct((Cp, Mp), jnp.float32),
        grid=(Mp // TM,),
        in_specs=[
            pl.BlockSpec((Cp, K), lambda i: (0, 0)),    # weights, resident
            pl.BlockSpec((K, TM), lambda i: (0, i)),    # patch columns
            pl.BlockSpec((Cp, 1), lambda i: (0, 0)),    # bias - 42
        ],
        out_specs=pl.BlockSpec((Cp, TM), lambda i: (0, i)),
        compiler_params=pltpu.CompilerParams(
            dimension_semantics=("parallel",),
        ),
    )(w2d, patchesT, b2d)

    # strip padding; (Cout, N*Do*Ho*Wo) is already channel-major -> NCDHW
    out = out2d[:Cout, :M].reshape(Cout, N, Do, Ho, Wo)
    out = jnp.transpose(out, (1, 0, 2, 3, 4))
    return out


if __name__ == "__main__":
    key = jax.random.PRNGKey(0)
    kx, kw, kb = jax.random.split(key, 3)

    # input matching the PyTorch module: torch.randn(1, 1, 3, 4, 5)
    x = jax.random.normal(kx, (1, 1, 3, 4, 5), dtype=jnp.float32)

    # Conv3d(1, 10, (2, 3, 4)) parameters, deterministic init
    Cout, Cin, Kd, Kh, Kw = 10, 1, 2, 3, 4
    fan_in = Cin * Kd * Kh * Kw
    bound = 1.0 / (fan_in ** 0.5)
    weight = jax.random.uniform(kw, (Cout, Cin, Kd, Kh, Kw),
                                minval=-bound, maxval=bound, dtype=jnp.float32)
    bias = jax.random.uniform(kb, (Cout,),
                              minval=-bound, maxval=bound, dtype=jnp.float32)

    conv_fn = jax.jit(conv3d_sub42)
    out = conv_fn(x, weight, bias)
    jax.block_until_ready(out)
    assert out.shape == (1, 10, 3, 3, 3), out.shape

    # sanity check against a pure-JAX conv reference (bf16-matmul tolerance)
    ref = jax.lax.conv_general_dilated(
        x, weight, window_strides=(2, 2, 2),
        padding=((2, 2), (2, 2), (2, 2)),
        dimension_numbers=("NCDHW", "OIDHW", "NCDHW"),
        precision=jax.lax.Precision.HIGHEST,
    ) + bias.reshape(1, Cout, 1, 1, 1) - 42.0
    assert jnp.max(jnp.abs(out - ref)) < 5e-2, "mismatch vs reference conv"

    print("KERNEL_OK")
</pallas_src>

<mosaic_0001>
module attributes {stable_mosaic.version = 11 : i64} {
  func.func @_conv_matmul_kernel(%arg0: i32, %arg1: memref<16x24xbf16, #tpu.memory_space<vmem>>, %arg2: memref<24x128xbf16, #tpu.memory_space<vmem>>, %arg3: memref<16x1xf32, #tpu.memory_space<vmem>>, %arg4: memref<16x128xf32, #tpu.memory_space<vmem>>) attributes {dimension_semantics = [#tpu.dimension_semantics<parallel>], iteration_bounds = array<i64: 1>, scalar_prefetch = 0 : i64, scratch_operands = 0 : i64, tpu.core_type = #tpu.core_type<tc>, window_params = [{pipeline_mode = #tpu.pipeline_mode<synchronous>, transform_indices = @transform_0, window_bounds = array<i64: 16, 24>}, {transform_indices = @transform_1, window_bounds = array<i64: 24, 128>}, {pipeline_mode = #tpu.pipeline_mode<synchronous>, transform_indices = @transform_2, window_bounds = array<i64: 16, 1>}, {transform_indices = @transform_3, window_bounds = array<i64: 16, 128>}]} {
    %c0 = arith.constant 0 : index
    %c0_0 = arith.constant 0 : index
    %0 = vector.load %arg1[%c0, %c0_0] : memref<16x24xbf16, #tpu.memory_space<vmem>>, vector<16x24xbf16>
    %c0_1 = arith.constant 0 : index
    %c0_2 = arith.constant 0 : index
    %1 = vector.load %arg2[%c0_1, %c0_2] : memref<24x128xbf16, #tpu.memory_space<vmem>>, vector<24x128xbf16>
    %cst = arith.constant dense<0.000000e+00> : vector<16x128xf32>
    %2 = tpu.matmul %0, %1, %cst {dimension_numbers = #tpu.dot_dimension_numbers<[1], [0], [0], [1], [0, 0, 1, 1], [], []>} : vector<16x24xbf16>, vector<24x128xbf16>, vector<16x128xf32> -> vector<16x128xf32>
    %c0_3 = arith.constant 0 : index
    %c0_4 = arith.constant 0 : index
    %3 = vector.load %arg3[%c0_3, %c0_4] : memref<16x1xf32, #tpu.memory_space<vmem>>, vector<16x1xf32>
    %4 = vector.broadcast %3 : vector<16x1xf32> to vector<16x128xf32>
    %5 = arith.addf %2, %4 : vector<16x128xf32>
    %c0_5 = arith.constant 0 : index
    %c0_6 = arith.constant 0 : index
    %6 = vector.load %arg4[%c0_5, %c0_6] : memref<16x128xf32, #tpu.memory_space<vmem>>, vector<16x128xf32>
    tpu.vector_store %arg4[%c0_5, %c0_6], %5 {strides = array<i32>} : memref<16x128xf32, #tpu.memory_space<vmem>>, vector<16x128xf32>,
    return
  }
  func.func @transform_0(%arg0: i32) -> (i32, i32) {
    %c0_i32 = arith.constant 0 : i32
    %c0_i32_0 = arith.constant 0 : i32
    %c0_i32_1 = arith.constant 0 : i32
    return %c0_i32, %c0_i32_0 : i32, i32
  }
  func.func @transform_1(%arg0: i32) -> (i32, i32) {
    %c0_i32 = arith.constant 0 : i32
    %c0_i32_0 = arith.constant 0 : i32
    return %c0_i32, %arg0 : i32, i32
  }
  func.func @transform_2(%arg0: i32) -> (i32, i32) {
    %c0_i32 = arith.constant 0 : i32
    %c0_i32_0 = arith.constant 0 : i32
    %c0_i32_1 = arith.constant 0 : i32
    return %c0_i32, %c0_i32_0 : i32, i32
  }
  func.func @transform_3(%arg0: i32) -> (i32, i32) {
    %c0_i32 = arith.constant 0 : i32
    %c0_i32_0 = arith.constant 0 : i32
    return %c0_i32, %arg0 : i32, i32
  }
}

</mosaic_0001>

<bundles_post_ra>
// kernel: conv3d_sub42.1
= control target key start
LH: loop header
LB: loop body
LE: loop exit
PB: predicated region body
PF: predicated region fallthrough
CT: control target
= control target key end

     0   :  { %vm50_vm0 = vcmask 1043456   ;;  %v123_v0 = vmov 0.0   ;;  %vm124_vm1 = vmmov 0   ;;  %v125_v3 = vmov 0   ;;  %s167_s1 = inlined_call_operand.vmem [shape: bf16[24,128], index: 1, kind: input, shape index: {}]   ;;  %s168_s2 = inlined_call_operand.vmem [shape: f32[16,1], index: 2, kind: input, shape index: {}]   ;;  %s169_s0 = inlined_call_operand.vmem [shape: bf16[16,24], index: 0, kind: input, shape index: {}]   ;;  %s170_s3 = inlined_call_operand.vmem [shape: f32[16,128], index: 3, kind: output, shape index: {}]  }
   0x1   :  { %108 = vmatprep.subr.bf16.mxu0 %v123_v0  ;;  %v120_v1 = vld [vmem:[%s167_s1] sm:$0xff]   ;;  %112 = vmatprep.mubr.msk.bf16.mxu0 %vm124_vm1, %v123_v0  ;;  %v121_v2 = vld [vmem:[%s167_s1 + $0x8] ss:$0 sps:$4 sm:$0xff]   ;;  %vm46_vm2 = vcmask 195584  }
   0x2   :  { %119 = vset.pattern.permute.xlu0 %v125_v3  ;;  %109 = vmatpush3.bf16.msra.mxu0 %v120_v1  ;;  %v20_v4 = vld [vmem:[%s168_s2] sm:$0xff]  ;;  %v52_v5 = vsel %vm50_vm0, %v121_v2, 0  ;;  %v21_v6 = vld [vmem:[%s168_s2 + $0x8] sm:$0xff] }
   0x3   :  { %110 = vmatprep.subr.bf16.mxu0 %v123_v0  ;;  %24 = vperm.xlu0 %119, %v20_v4   ;;  %v122_v7 = vld [vmem:[%s169_s0] sm:$0xff]  }
   0x6   :  { %111 = vmatpush3.bf16.msra.mxu0 %v52_v5 }
   0x7   :  { %29 = vperm.xlu0 %119, %v21_v6  }
   0x9   :  { %113 = vmatmul.mubr.msk.bf16.vlgmr.msra.gmra.mrb[0].mxu0 %vm46_vm2, %v122_v7 }
  0x82   :  { %v25_v8 = vpop.permute.xlu0 %24 }
  0x86   :  { %v30_v12 = vpop.permute.xlu0 %29 }
  0xdc   :  { %v88_v9 = vpop.f32.mrb[0].mxu0 }
  0xdd   :  { %v89_v10 = vadd.f32 %v88_v9, %v25_v8  ;;  %v114_v11 = vpop.f32.mrb[1].mxu0 }
  0xde   :  { %v91_v13 = vpop.f32.mrb[2].mxu0 }
  0xdf   :  { %95 = vst [vmem:[%s170_s3] sm:$0xff] %v89_v10  ;;  %v92_v14 = vadd.f32 %v91_v13, %v30_v12  ;;  %v115_v15 = vpop.f32.mrb[3].mxu0 }
  0xe1   :  { %96 = vst [vmem:[%s170_s3 + $0x8] sm:$0xff] %v92_v14 }

</bundles_post_ra>
